<compile_context>
chip_gen: v6e
topology: v6e:2x2x1
jax: 0.10.0
libtpu: 0.0.40
codegen_flags: <defaults>
</compile_context>

<pallas_src>
import jax
import jax.numpy as jnp
from jax.experimental import pallas as pl
from jax.experimental.pallas import tpu as pltpu


def _dma_copy_kernel(x_hbm, o_hbm, sem):
    """Whole-array HBM->HBM copy: one DMA descriptor, no VMEM staging."""
    cp = pltpu.make_async_copy(x_hbm, o_hbm, sem)
    cp.start()
    cp.wait()


def identity_forward(
    x: jax.Array,
    *,
    force_copy_kernel: bool = False,
    alias_input: bool = False,
) -> jax.Array:
    """Pallas implementation of Identity.forward.

    Default: true no-op (returns x) — the correct cost for an identity op.

    force_copy_kernel=True: route through a Pallas kernel that performs the
    identity as a single whole-array HBM->HBM DMA (validates the Pallas path).

    alias_input=True (with force_copy_kernel=True): additionally alias the
    output to the input buffer via input_output_aliases={0: 0}.  Intended to
    be used under jax.jit with donate_argnums so the output reuses x's HBM
    buffer and no second full-size allocation is made.
    """
    if not force_copy_kernel:
        return x

    # Degenerate shapes: nothing to copy / no benefit from a kernel.
    if x.size == 0 or x.ndim == 0:
        return x

    return pl.pallas_call(
        _dma_copy_kernel,
        out_shape=jax.ShapeDtypeStruct(x.shape, x.dtype),
        # Raw HBM refs on both sides: Pallas does no automatic VMEM staging,
        # the kernel issues exactly one DMA for the whole array.
        in_specs=[pl.BlockSpec(memory_space=pl.ANY)],
        out_specs=pl.BlockSpec(memory_space=pl.ANY),
        scratch_shapes=[pltpu.SemaphoreType.DMA(())],
        input_output_aliases=({0: 0} if alias_input else {}),
    )(x)


# Static helpers of the PyTorch module, reproduced in plain JAX (not part of
# the forward hot path; kept for semantic completeness).
def probabilities(logits: jax.Array) -> jax.Array:
    return jax.nn.softmax(logits, axis=1)


def predictions(logits: jax.Array) -> jax.Array:
    return jnp.argmax(logits, axis=1)


def loss(logits: jax.Array, labels: jax.Array) -> jax.Array:
    logp = jax.nn.log_softmax(logits, axis=1)
    nll = -jnp.take_along_axis(logp, labels[:, None], axis=1)[:, 0]
    return jnp.mean(nll)


if __name__ == "__main__":
    key = jax.random.PRNGKey(0)
    # Identity(in_channels=4) applied to an NCHW tensor.
    x = jax.random.normal(key, (2, 4, 16, 16), dtype=jnp.float32)

    # 1) Default path: true no-op (the architecturally correct Identity).
    y_noop = identity_forward(x)

    # 2) Forced Pallas path: single whole-array HBM->HBM DMA into a fresh
    #    output buffer.
    y_dma = identity_forward(x, force_copy_kernel=True)

    # 3) Forced Pallas path with input/output aliasing + donation: the output
    #    reuses the donated input's HBM buffer (no second allocation).
    fwd_alias = jax.jit(
        lambda a: identity_forward(a, force_copy_kernel=True, alias_input=True),
        donate_argnums=(0,),
    )
    # Build an independent buffer with identical values so we can donate it
    # while keeping `x` alive for the checks below.
    x_donate = jax.random.normal(key, (2, 4, 16, 16), dtype=jnp.float32)
    y_alias = fwd_alias(x_donate)
    del x_donate  # donated; must not be used again

    jax.block_until_ready((y_noop, y_dma, y_alias))

    for y in (y_noop, y_dma, y_alias):
        assert y.shape == x.shape and y.dtype == x.dtype
        assert bool(jnp.all(y == x))
    print("KERNEL_OK")
</pallas_src>

<mosaic_0001>
module attributes {stable_mosaic.version = 11 : i64} {
  func.func @_dma_copy_kernel(%arg0: memref<2x4x16x16xf32, #tpu.memory_space<any>>, %arg1: memref<2x4x16x16xf32, #tpu.memory_space<any>>, %arg2: memref<!tpu.dma_semaphore, #tpu.memory_space<semaphore_mem>>) attributes {dimension_semantics = [], scalar_prefetch = 0 : i64, scratch_operands = 1 : i64, tpu.core_type = #tpu.core_type<tc>} {
    tpu.enqueue_dma source(%arg0 : memref<2x4x16x16xf32, #tpu.memory_space<any>>) target(%arg1 : memref<2x4x16x16xf32, #tpu.memory_space<any>>) target_semaphore(%arg2 : memref<!tpu.dma_semaphore, #tpu.memory_space<semaphore_mem>>)
    tpu.wait_dma2 semaphore(%arg2 : memref<!tpu.dma_semaphore, #tpu.memory_space<semaphore_mem>>) src(%arg0 : memref<2x4x16x16xf32, #tpu.memory_space<any>>) dst(%arg1 : memref<2x4x16x16xf32, #tpu.memory_space<any>>)
    return
  }
}

</mosaic_0001>

<bundles_post_ra>
// kernel: tpu_custom_call.1
= control target key start
LH: loop header
LB: loop body
LE: loop exit
PB: predicated region body
PF: predicated region fallthrough
CT: control target
= control target key end

     0   :  { %s30_s6 = smov [#allocation2]   ;;  %s31_s7 = smov 131072   ;;  %s49_s0 = inlined_call_operand.hbm [shape: f32[2,4,16,16], index: 0, kind: input, shape index: {}]   ;;  %s50_s1 = inlined_call_operand.hbm [shape: f32[2,4,16,16], index: 1, kind: output, shape index: {}]  }
   0x1   :  { %s32_s8 = smov 0  }
   0x2   :  { %12 = dma.general %s49_s0, 2048, %s50_s1, %s30_s6, %s31_s7, [#allocation4], %s32_s8, 0  }
   0x3   :  { %28 = dma.done.wait [#allocation2], 2048 }
   0x4   :  { %29 = vsyncadd [#allocation2], 4294965248 }
   0x5   :  { %18 = vsyncmov [#allocation2] }
   0x8   :  { %s19_s13 = vpop.sfrf %18 }
   0x9   :  { %p24_p0 = scmp.ne.s32.totalorder %s19_s13, 0 }
   0xb   :  { %23 = shalt.err (%p24_p0)  }

</bundles_post_ra>
